<compile_context>
chip_gen: v5e
topology: v5e:2x2
jax: 0.10.0
libtpu: 0.0.40
codegen_flags: <defaults>
</compile_context>

<pallas_src>
import jax
import jax.numpy as jnp
from jax import lax
from jax.experimental import pallas as pl
from jax.experimental.pallas import tpu as pltpu

_MIB = 1 << 20


def _pick_tile(C, L, N):
    """Input-length tile: 256 only when C >= 256 (keeps the interleave matmul
    bounded by the conv's MXU work), else 128.  Force 128 when N == 1 and the
    grid would otherwise have a single program (v7x has 2 TensorCores)."""
    tl = 256 if C >= 256 else 128
    if N == 1 and -(-L // tl) < 2:
        tl = 128
    nt = -(-L // tl)
    return tl, nt


def _interleave_onehots(tl, dtype):
    """(2, tl, 2tl): one-hot matrices scattering input column i to output
    columns 2i / 2i+1 (exact selection in any dtype)."""
    rows = jnp.arange(tl)[:, None]
    cols = jnp.arange(2 * tl)[None, :]
    u_e = (cols == 2 * rows).astype(dtype)
    u_o = (cols == 2 * rows + 1).astype(dtype)
    return jnp.stack([u_e, u_o], axis=0)


def _upsample_conv_kernel(x_ref, hp_ref, hn_ref, w_ref, b_ref, u_ref, o_ref):
    # x_ref : (1, C, tl)      input tile (read from HBM exactly once)
    # hp_ref: (1, 1, C, 1)    x[:, i*tl - 1] halo column (0 for the first tile)
    # hn_ref: (1, 1, C, 1)    x[:, (i+1)*tl] halo column (0 past the end)
    # w_ref : (4, C, C)       folded taps [W0, W1+W2, W0+W1, W2]   (resident)
    # b_ref : (C, 1) f32      bias                                  (resident)
    # u_ref : (2, tl, 2tl)    even/odd interleave one-hots          (resident)
    # o_ref : (1, C, 2tl)     output tile (lane-dense)
    tl = x_ref.shape[2]
    x_t = x_ref[0]                                    # (C, tl)
    hp = hp_ref[0, 0]                                 # (C, 1)
    hn = hn_ref[0, 0]                                 # (C, 1)

    col = lax.broadcasted_iota(jnp.int32, (1, tl), 1)
    # x_prev[:, j] = x[:, j-1] ; x_next[:, j] = x[:, j+1]  (halo at the edges).
    x_prev = jnp.where(col == 0, hp, pltpu.roll(x_t, 1, axis=1))
    x_next = jnp.where(col == tl - 1, hn, pltpu.roll(x_t, tl - 1, axis=1))

    even = (jnp.dot(w_ref[0], x_prev, preferred_element_type=jnp.float32)
            + jnp.dot(w_ref[1], x_t, preferred_element_type=jnp.float32)
            + b_ref[...])                             # (C, tl) f32
    odd = (jnp.dot(w_ref[2], x_t, preferred_element_type=jnp.float32)
           + jnp.dot(w_ref[3], x_next, preferred_element_type=jnp.float32)
           + b_ref[...])                              # (C, tl) f32

    # Interleave even/odd columns with exact one-hot selection at the OUTPUT
    # dtype (bf16-rate matmuls for bf16 outputs).
    even_c = even.astype(o_ref.dtype)
    odd_c = odd.astype(o_ref.dtype)
    out = (jnp.dot(even_c, u_ref[0], preferred_element_type=jnp.float32)
           + jnp.dot(odd_c, u_ref[1], preferred_element_type=jnp.float32))
    o_ref[0] = out.astype(o_ref.dtype)


def upsample_forward(x, weight=None, bias=None, *, with_conv=True):
    """x: (N, C, L).  weight: (C, C, 3) PyTorch Conv1d layout.  bias: (C,)."""
    N, C, L = x.shape

    if not with_conv:
        # Nearest x2 is a pure-bandwidth copy: per the perf review the one-hot
        # replication matmul is dropped; XLA's repeat is already optimal.
        return jnp.repeat(x, 2, axis=-1)

    out_dtype = x.dtype
    tl, nt = _pick_tile(C, L, N)
    Lp = nt * tl
    xp = x if Lp == L else jnp.pad(x, ((0, 0), (0, 0), (0, Lp - L)))

    # Per-tile halo columns (tiny: N*C*nt elements each).
    #   halo_prev[n, i] = x[n, :, i*tl - 1]   (0 for i == 0  -> conv left pad)
    #   halo_next[n, i] = x[n, :, (i+1)*tl]   (0 past the end -> conv right pad)
    xl = jnp.pad(xp, ((0, 0), (0, 0), (1, 0)))[:, :, 0:Lp:tl]        # (N, C, nt)
    xr = jnp.pad(xp, ((0, 0), (0, 0), (0, 1)))[:, :, tl:Lp + 1:tl]   # (N, C, nt)
    halo_prev = jnp.transpose(xl, (0, 2, 1))[..., None]              # (N, nt, C, 1)
    halo_next = jnp.transpose(xr, (0, 2, 1))[..., None]              # (N, nt, C, 1)

    # Fold the 3 conv taps in f32, then cast:  even -> W0, W1+W2 ; odd -> W0+W1, W2.
    wf = weight.astype(jnp.float32)
    w0, w1, w2 = wf[:, :, 0], wf[:, :, 1], wf[:, :, 2]
    w_taps = jnp.stack([w0, w1 + w2, w0 + w1, w2], axis=0).astype(x.dtype)  # (4, C, C)
    b2 = bias.reshape(C, 1).astype(jnp.float32)
    u_eo = _interleave_onehots(tl, out_dtype)                        # (2, tl, 2tl)

    # VMEM budget (per-block buffers are double-buffered by the pipeline),
    # clamped against the physical VMEM of the current TPU generation.
    isz = jnp.dtype(x.dtype).itemsize
    osz = jnp.dtype(out_dtype).itemsize
    blk = C * tl * isz + 2 * C * isz + C * 2 * tl * osz
    res = 4 * C * C * isz + C * 4 + 2 * tl * 2 * tl * osz
    tmp = (4 * C * tl + 2 * C * 2 * tl) * 4
    need = 2 * (blk + res) + tmp
    try:
        cap = int(pltpu.get_tpu_info().vmem_capacity_bytes)
    except Exception:
        cap = 64 * _MIB  # conservative fallback (v7x per-core VMEM)
    vmem = int(min(max(need + 16 * _MIB, 32 * _MIB), max(cap - 16 * _MIB, 32 * _MIB)))

    out_p = pl.pallas_call(
        _upsample_conv_kernel,
        out_shape=jax.ShapeDtypeStruct((N, C, 2 * Lp), out_dtype),
        grid_spec=pltpu.PrefetchScalarGridSpec(
            num_scalar_prefetch=0,
            grid=(N, nt),
            in_specs=[
                pl.BlockSpec((1, C, tl), lambda n, i: (n, 0, i)),
                pl.BlockSpec((1, 1, C, 1), lambda n, i: (n, i, 0, 0)),
                pl.BlockSpec((1, 1, C, 1), lambda n, i: (n, i, 0, 0)),
                pl.BlockSpec((4, C, C), lambda n, i: (0, 0, 0)),        # resident
                pl.BlockSpec((C, 1), lambda n, i: (0, 0)),              # resident
                pl.BlockSpec((2, tl, 2 * tl), lambda n, i: (0, 0, 0)),  # resident
            ],
            out_specs=pl.BlockSpec((1, C, 2 * tl), lambda n, i: (n, 0, i)),
        ),
        compiler_params=pltpu.CompilerParams(
            dimension_semantics=("parallel", "parallel"),
            vmem_limit_bytes=vmem),
    )(xp, halo_prev, halo_next, w_taps, b2, u_eo)

    return out_p if Lp == L else out_p[:, :, :2 * L]


def _reference_forward(x, weight, bias, with_conv):
    xu = jnp.repeat(x, 2, axis=-1)
    if not with_conv:
        return xu
    out = lax.conv_general_dilated(
        xu, weight, window_strides=(1,), padding=((1, 1),),
        dimension_numbers=("NCH", "OIH", "NCH"))
    return out + bias[None, :, None]


if __name__ == "__main__":
    key = jax.random.PRNGKey(0)
    keys = jax.random.split(key, 9)

    def make_case(kx, kw, kb, N, C, L):
        x = jax.random.normal(kx, (N, C, L), dtype=jnp.float32)
        bound = 1.0 / (C * 3) ** 0.5
        w = jax.random.uniform(kw, (C, C, 3), jnp.float32, -bound, bound)
        b = jax.random.uniform(kb, (C,), jnp.float32, -bound, bound)
        return x, w, b

    # 1) Small shape consistent with the module (exercises L padding 16 -> 128).
    x, w, b = make_case(keys[0], keys[1], keys[2], 2, 4, 16)
    out = jax.block_until_ready(upsample_forward(x, w, b, with_conv=True))
    ref = _reference_forward(x, w, b, True)
    assert out.shape == ref.shape == (2, 4, 32)
    assert jnp.allclose(out, ref, atol=1e-5, rtol=1e-5), float(jnp.max(jnp.abs(out - ref)))

    out_nc = jax.block_until_ready(upsample_forward(x, with_conv=False))
    assert jnp.allclose(out_nc, _reference_forward(x, w, b, False)), "upsample-only mismatch"

    # 2) Multi-tile + halo + ragged L (200 -> padded to 256, tl=128, nt=2).
    x, w, b = make_case(keys[3], keys[4], keys[5], 2, 8, 200)
    out = jax.block_until_ready(upsample_forward(x, w, b, with_conv=True))
    ref = _reference_forward(x, w, b, True)
    assert jnp.allclose(out, ref, atol=1e-4, rtol=1e-4), float(jnp.max(jnp.abs(out - ref)))

    # 3) Larger channel count (tl=256 path) with padding (384 -> 512, nt=2).
    x, w, b = make_case(keys[6], keys[7], keys[8], 1, 256, 384)
    out = jax.block_until_ready(upsample_forward(x, w, b, with_conv=True))
    ref = _reference_forward(x, w, b, True)
    assert jnp.allclose(out, ref, atol=5e-4, rtol=5e-4), float(jnp.max(jnp.abs(out - ref)))

    print("KERNEL_OK")
</pallas_src>

<mosaic_0001>
module attributes {stable_mosaic.version = 11 : i64} {
  func.func @_upsample_conv_kernel(%arg0: i32, %arg1: i32, %arg2: memref<1x4x128xf32, #tpu.memory_space<vmem>>, %arg3: memref<1x1x4x1xf32, #tpu.memory_space<vmem>>, %arg4: memref<1x1x4x1xf32, #tpu.memory_space<vmem>>, %arg5: memref<4x4x4xf32, #tpu.memory_space<vmem>>, %arg6: memref<4x1xf32, #tpu.memory_space<vmem>>, %arg7: memref<2x128x256xf32, #tpu.memory_space<vmem>>, %arg8: memref<1x4x256xf32, #tpu.memory_space<vmem>>) attributes {dimension_semantics = [#tpu.dimension_semantics<parallel>, #tpu.dimension_semantics<parallel>], iteration_bounds = array<i64: 2, 1>, scalar_prefetch = 0 : i64, scratch_operands = 0 : i64, tpu.core_type = #tpu.core_type<tc>, window_params = [{transform_indices = @transform_0, window_bounds = array<i64: 1, 4, 128>}, {transform_indices = @transform_1, window_bounds = array<i64: 1, 1, 4, 1>}, {transform_indices = @transform_2, window_bounds = array<i64: 1, 1, 4, 1>}, {pipeline_mode = #tpu.pipeline_mode<synchronous>, transform_indices = @transform_3, window_bounds = array<i64: 4, 4, 4>}, {pipeline_mode = #tpu.pipeline_mode<synchronous>, transform_indices = @transform_4, window_bounds = array<i64: 4, 1>}, {pipeline_mode = #tpu.pipeline_mode<synchronous>, transform_indices = @transform_5, window_bounds = array<i64: 2, 128, 256>}, {transform_indices = @transform_6, window_bounds = array<i64: 1, 4, 256>}]} {
    %c0 = arith.constant 0 : index
    %c0_0 = arith.constant 0 : index
    %c0_1 = arith.constant 0 : index
    %0 = vector.load %arg2[%c0, %c0_0, %c0_1] : memref<1x4x128xf32, #tpu.memory_space<vmem>>, vector<1x4x128xf32>
    %1 = vector.shape_cast %0 : vector<1x4x128xf32> to vector<4x128xf32>
    %c0_2 = arith.constant 0 : index
    %c0_3 = arith.constant 0 : index
    %c0_4 = arith.constant 0 : index
    %c0_5 = arith.constant 0 : index
    %2 = vector.load %arg3[%c0_2, %c0_3, %c0_4, %c0_5] : memref<1x1x4x1xf32, #tpu.memory_space<vmem>>, vector<1x1x4x1xf32>
    %3 = vector.shape_cast %2 : vector<1x1x4x1xf32> to vector<4x1xf32>
    %c0_6 = arith.constant 0 : index
    %c0_7 = arith.constant 0 : index
    %c0_8 = arith.constant 0 : index
    %c0_9 = arith.constant 0 : index
    %4 = vector.load %arg4[%c0_6, %c0_7, %c0_8, %c0_9] : memref<1x1x4x1xf32, #tpu.memory_space<vmem>>, vector<1x1x4x1xf32>
    %5 = vector.shape_cast %4 : vector<1x1x4x1xf32> to vector<4x1xf32>
    %6 = tpu.iota {dimensions = array<i32: 1>} : vector<1x128xi32>
    %c0_i32 = arith.constant 0 : i32
    %7 = vector.broadcast %c0_i32 : i32 to vector<1x128xi32>
    %8 = arith.cmpi eq, %6, %7 : vector<1x128xi32>
    %c1_i32 = arith.constant 1 : i32
    %9 = tpu.dynamic_rotate %1 by %c1_i32 dim 1 : vector<4x128xf32>, i32 -> vector<4x128xf32>
    %10 = vector.shape_cast %8 : vector<1x128xi1> to vector<1x128xi1>
    %11 = vector.broadcast %10 : vector<1x128xi1> to vector<4x128xi1>
    %12 = vector.shape_cast %3 : vector<4x1xf32> to vector<4x1xf32>
    %13 = vector.broadcast %12 : vector<4x1xf32> to vector<4x128xf32>
    %14 = arith.select %11, %13, %9 : vector<4x128xi1>, vector<4x128xf32>
    %c127_i32 = arith.constant 127 : i32
    %15 = vector.broadcast %c127_i32 : i32 to vector<1x128xi32>
    %16 = arith.cmpi eq, %6, %15 : vector<1x128xi32>
    %c127_i32_10 = arith.constant 127 : i32
    %17 = tpu.dynamic_rotate %1 by %c127_i32_10 dim 1 : vector<4x128xf32>, i32 -> vector<4x128xf32>
    %18 = vector.shape_cast %16 : vector<1x128xi1> to vector<1x128xi1>
    %19 = vector.broadcast %18 : vector<1x128xi1> to vector<4x128xi1>
    %20 = vector.shape_cast %5 : vector<4x1xf32> to vector<4x1xf32>
    %21 = vector.broadcast %20 : vector<4x1xf32> to vector<4x128xf32>
    %22 = arith.select %19, %21, %17 : vector<4x128xi1>, vector<4x128xf32>
    %c0_11 = arith.constant 0 : index
    %c0_12 = arith.constant 0 : index
    %c0_13 = arith.constant 0 : index
    %23 = vector.load %arg5[%c0_11, %c0_12, %c0_13] : memref<4x4x4xf32, #tpu.memory_space<vmem>>, vector<1x4x4xf32>
    %24 = vector.shape_cast %23 : vector<1x4x4xf32> to vector<4x4xf32>
    %cst = arith.constant dense<0.000000e+00> : vector<4x128xf32>
    %25 = tpu.matmul %24, %14, %cst {dimension_numbers = #tpu.dot_dimension_numbers<[1], [0], [0], [1], [0, 0, 1, 1], [], []>} : vector<4x4xf32>, vector<4x128xf32>, vector<4x128xf32> -> vector<4x128xf32>
    %c1 = arith.constant 1 : index
    %c0_14 = arith.constant 0 : index
    %c0_15 = arith.constant 0 : index
    %26 = vector.load %arg5[%c1, %c0_14, %c0_15] : memref<4x4x4xf32, #tpu.memory_space<vmem>>, vector<1x4x4xf32>
    %27 = vector.shape_cast %26 : vector<1x4x4xf32> to vector<4x4xf32>
    %cst_16 = arith.constant dense<0.000000e+00> : vector<4x128xf32>
    %28 = tpu.matmul %27, %1, %cst_16 {dimension_numbers = #tpu.dot_dimension_numbers<[1], [0], [0], [1], [0, 0, 1, 1], [], []>} : vector<4x4xf32>, vector<4x128xf32>, vector<4x128xf32> -> vector<4x128xf32>
    %29 = arith.addf %25, %28 : vector<4x128xf32>
    %c0_17 = arith.constant 0 : index
    %c0_18 = arith.constant 0 : index
    %30 = vector.load %arg6[%c0_17, %c0_18] : memref<4x1xf32, #tpu.memory_space<vmem>>, vector<4x1xf32>
    %31 = vector.broadcast %30 : vector<4x1xf32> to vector<4x128xf32>
    %32 = arith.addf %29, %31 : vector<4x128xf32>
    %c2 = arith.constant 2 : index
    %c0_19 = arith.constant 0 : index
    %c0_20 = arith.constant 0 : index
    %33 = vector.load %arg5[%c2, %c0_19, %c0_20] : memref<4x4x4xf32, #tpu.memory_space<vmem>>, vector<1x4x4xf32>
    %34 = vector.shape_cast %33 : vector<1x4x4xf32> to vector<4x4xf32>
    %cst_21 = arith.constant dense<0.000000e+00> : vector<4x128xf32>
    %35 = tpu.matmul %34, %1, %cst_21 {dimension_numbers = #tpu.dot_dimension_numbers<[1], [0], [0], [1], [0, 0, 1, 1], [], []>} : vector<4x4xf32>, vector<4x128xf32>, vector<4x128xf32> -> vector<4x128xf32>
    %c3 = arith.constant 3 : index
    %c0_22 = arith.constant 0 : index
    %c0_23 = arith.constant 0 : index
    %36 = vector.load %arg5[%c3, %c0_22, %c0_23] : memref<4x4x4xf32, #tpu.memory_space<vmem>>, vector<1x4x4xf32>
    %37 = vector.shape_cast %36 : vector<1x4x4xf32> to vector<4x4xf32>
    %cst_24 = arith.constant dense<0.000000e+00> : vector<4x128xf32>
    %38 = tpu.matmul %37, %22, %cst_24 {dimension_numbers = #tpu.dot_dimension_numbers<[1], [0], [0], [1], [0, 0, 1, 1], [], []>} : vector<4x4xf32>, vector<4x128xf32>, vector<4x128xf32> -> vector<4x128xf32>
    %39 = arith.addf %35, %38 : vector<4x128xf32>
    %c0_25 = arith.constant 0 : index
    %c0_26 = arith.constant 0 : index
    %40 = vector.load %arg6[%c0_25, %c0_26] : memref<4x1xf32, #tpu.memory_space<vmem>>, vector<4x1xf32>
    %41 = vector.broadcast %40 : vector<4x1xf32> to vector<4x128xf32>
    %42 = arith.addf %39, %41 : vector<4x128xf32>
    %c0_27 = arith.constant 0 : index
    %c0_28 = arith.constant 0 : index
    %c0_29 = arith.constant 0 : index
    %43 = vector.load %arg7[%c0_27, %c0_28, %c0_29] : memref<2x128x256xf32, #tpu.memory_space<vmem>>, vector<1x128x256xf32>
    %44 = vector.shape_cast %43 : vector<1x128x256xf32> to vector<128x256xf32>
    %cst_30 = arith.constant dense<0.000000e+00> : vector<4x256xf32>
    %45 = tpu.matmul %32, %44, %cst_30 {dimension_numbers = #tpu.dot_dimension_numbers<[1], [0], [0], [1], [0, 0, 1, 1], [], []>} : vector<4x128xf32>, vector<128x256xf32>, vector<4x256xf32> -> vector<4x256xf32>
    %c1_31 = arith.constant 1 : index
    %c0_32 = arith.constant 0 : index
    %c0_33 = arith.constant 0 : index
    %46 = vector.load %arg7[%c1_31, %c0_32, %c0_33] : memref<2x128x256xf32, #tpu.memory_space<vmem>>, vector<1x128x256xf32>
    %47 = vector.shape_cast %46 : vector<1x128x256xf32> to vector<128x256xf32>
    %cst_34 = arith.constant dense<0.000000e+00> : vector<4x256xf32>
    %48 = tpu.matmul %42, %47, %cst_34 {dimension_numbers = #tpu.dot_dimension_numbers<[1], [0], [0], [1], [0, 0, 1, 1], [], []>} : vector<4x128xf32>, vector<128x256xf32>, vector<4x256xf32> -> vector<4x256xf32>
    %49 = arith.addf %45, %48 : vector<4x256xf32>
    %c0_35 = arith.constant 0 : index
    %c0_36 = arith.constant 0 : index
    %c0_37 = arith.constant 0 : index
    %50 = vector.load %arg8[%c0_35, %c0_36, %c0_37] : memref<1x4x256xf32, #tpu.memory_space<vmem>>, vector<1x4x256xf32>
    %51 = vector.shape_cast %50 : vector<1x4x256xf32> to vector<4x256xf32>
    %52 = vector.shape_cast %49 : vector<4x256xf32> to vector<1x4x256xf32>
    tpu.vector_store %arg8[%c0_35, %c0_36, %c0_37], %52 {strides = array<i32>} : memref<1x4x256xf32, #tpu.memory_space<vmem>>, vector<1x4x256xf32>,
    return
  }
  func.func @transform_0(%arg0: i32, %arg1: i32) -> (i32, i32, i32) {
    %c0_i32 = arith.constant 0 : i32
    %c0_i32_0 = arith.constant 0 : i32
    return %arg0, %c0_i32, %arg1 : i32, i32, i32
  }
  func.func @transform_1(%arg0: i32, %arg1: i32) -> (i32, i32, i32, i32) {
    %c0_i32 = arith.constant 0 : i32
    %c0_i32_0 = arith.constant 0 : i32
    %c0_i32_1 = arith.constant 0 : i32
    return %arg0, %arg1, %c0_i32, %c0_i32_0 : i32, i32, i32, i32
  }
  func.func @transform_2(%arg0: i32, %arg1: i32) -> (i32, i32, i32, i32) {
    %c0_i32 = arith.constant 0 : i32
    %c0_i32_0 = arith.constant 0 : i32
    %c0_i32_1 = arith.constant 0 : i32
    return %arg0, %arg1, %c0_i32, %c0_i32_0 : i32, i32, i32, i32
  }
  func.func @transform_3(%arg0: i32, %arg1: i32) -> (i32, i32, i32) {
    %c0_i32 = arith.constant 0 : i32
    %c0_i32_0 = arith.constant 0 : i32
    %c0_i32_1 = arith.constant 0 : i32
    %c0_i32_2 = arith.constant 0 : i32
    return %c0_i32, %c0_i32_0, %c0_i32_1 : i32, i32, i32
  }
  func.func @transform_4(%arg0: i32, %arg1: i32) -> (i32, i32) {
    %c0_i32 = arith.constant 0 : i32
    %c0_i32_0 = arith.constant 0 : i32
    %c0_i32_1 = arith.constant 0 : i32
    return %c0_i32, %c0_i32_0 : i32, i32
  }
  func.func @transform_5(%arg0: i32, %arg1: i32) -> (i32, i32, i32) {
    %c0_i32 = arith.constant 0 : i32
    %c0_i32_0 = arith.constant 0 : i32
    %c0_i32_1 = arith.constant 0 : i32
    %c0_i32_2 = arith.constant 0 : i32
    return %c0_i32, %c0_i32_0, %c0_i32_1 : i32, i32, i32
  }
  func.func @transform_6(%arg0: i32, %arg1: i32) -> (i32, i32, i32) {
    %c0_i32 = arith.constant 0 : i32
    %c0_i32_0 = arith.constant 0 : i32
    return %arg0, %c0_i32, %arg1 : i32, i32, i32
  }
}

</mosaic_0001>

<bundles_post_ra>
// kernel: tpu_custom_call.1
= control target key start
LH: loop header
LB: loop body
LE: loop exit
PB: predicated region body
PF: predicated region fallthrough
CT: control target
= control target key end

     0   :  { %s1273_s0 = inlined_call_operand.hbm [shape: f32[2,4,128], index: 0, kind: input, shape index: {}]   ;;  %s1274_s1 = inlined_call_operand.vmem [shape: f32[2,1,4,1], index: 1, kind: input, shape index: {}]   ;;  %s1275_s2 = inlined_call_operand.vmem [shape: f32[2,1,4,1], index: 2, kind: input, shape index: {}]   ;;  %s1276_s3 = inlined_call_operand.vmem [shape: f32[4,4,4], index: 3, kind: input, shape index: {}]   ;;  %s1277_s4 = inlined_call_operand.vmem [shape: f32[4,1], index: 4, kind: input, shape index: {}]   ;;  %s1278_s5 = inlined_call_operand.hbm [shape: f32[2,128,256], index: 5, kind: input, shape index: {}]   ;;  %s1279_s6 = inlined_call_operand.hbm [shape: f32[2,4,256], index: 6, kind: output, shape index: {}]  }
   0x1   :  { %1280 = sst [smem:[#allocation11_spill]] %s1278_s5 }
   0x2   :  { %11 = vsyncpa [#allocation3], 0 }
   0x3   :  { %13 = vsyncpa [#allocation3 + $0x1], 0 }
   0x4   :  { %14 = vsyncpa [#allocation6], 0 }
   0x5   :  { %15 = vsyncpa [#allocation4], 0 }
   0x6   :  { %17 = vsyncpa [#allocation4 + $0x1], 0  ;;  %s1097_s21 = smov 0   ;;  %s1099_s22 = smov 0  }
   0x7   :  { %s1101_s23 = smov 0   ;;  %s1103_s24 = smov 0  }
   0x8   :  { %s1105_s25 = smov 0   ;;  %s1107_s26 = smov 0  }
   0x9 LB: > { %s797_s27 = sadd.s32 4294967295, %s1054_s26   ;;  %p799_p0 = scmp.ge.s32.totalorder %s1054_s26, 1  ;;  %s1054_s26 = sphi %s1107_s26, %s23_s26   ;;  %s1050_s25 = sphi %s1105_s25, %s1292_s25   ;;  %s1046_s24 = sphi %s1103_s24, %s1291_s24   ;;  %s1042_s23 = sphi %s1101_s23, %s1290_s23   ;;  %s1038_s22 = sphi %s1099_s22, %s1289_s22   ;;  %s1034_s21 = sphi %s1097_s21, %s1288_s21  }
   0xa   : > { %p1129_p1 = scmp.eq.s32.totalorder %s797_s27, 0  ;;  %p215_p2 = scmp.lt.s32.totalorder %s1054_s26, 3 }
   0xb   : > { %s1282_s5 = sld [smem:[#allocation11_spill]]  ;;  %s1056_s9 = smov [#allocation5]  }
   0xc   : > { %p1137_p3 = pnand %p799_p0, %p215_p2  ;;  %s234_s10 = sshll.u32 %s1056_s9, 4  ;;  %s235_s10 = int_to_ptr.vmem [resolvable:$true] %s234_s10 }
   0xd   : > { %p801_p6 = scmp.ge.s32.totalorder %s1054_s26, 2  ;;  %s1057_s11 = smov 256  }
   0xe   : > { %p835_p4 = pneg %p1137_p3  ;;  %s1058_s12 = smov 16  }
   0xf   : > { %s798_s13 = sadd.s32 4294967294, %s1054_s26   ;;  %s35_s14 = sadd.s32 1, %s1050_s25 }
  0x10   : > { %p836_p5 = pnand %p835_p4, %p1129_p1  ;;  %s44_s15 = sadd.s32 1, %s1042_s23 }
  0x11   : > { %s232_s7 = sshll.u32 %s1282_s5, 4  ;;  %p37_p7 = scmp.ge.s32.totalorder %s35_s14, 2  ;;  %s233_s7 = int_to_ptr.hbm [resolvable:$true] %s232_s7 }
  0x12   : > { %838 = dma.hbm_to_vmem [thread:$0]  (!%p836_p5), %s233_s7, 8192, %s235_s10, [#allocation6], %s1057_s11, %s1057_s11, %s1058_s12  }
  0x13   : > { %p51_p8 = scmp.ne.s32.totalorder %s1042_s23, %s1038_s22  ;;  %p52_p9 = scmp.eq.s32.totalorder %s1054_s26, 0 }
  0x14   : > { %p57_p10 = scmp.ne.s32.totalorder %s1038_s22, %s1034_s21  ;;  %s1294_s14 = smov (%p37_p7, %s35_s14), 0 }
  0x15   : > { %p1156_p11 = por %p52_p9, %p51_p8  ;;  %s39_s18 = ssub.s32 %s1050_s25, %s1294_s14 }
  0x16   : > { %p1162_p12 = por %p1129_p1, %p57_p10  ;;  %p202_p13 = scmp.eq.s32.totalorder %s797_s27, 1 }
  0x17   : > { %p42_p0 = scmp.eq.s32.totalorder %s39_s18, 0  ;;  %p208_p2 = scmp.eq.s32.totalorder %s798_s13, 1 }
  0x18   : > { %p1168_p4 = por %p202_p13, %p51_p8  ;;  %p848_p5 = scmp.lt.s32.totalorder %s1054_s26, 2 }
  0x19   : > { %s1174_s20 = scalar_select %p42_p0, %s1042_s23, %s44_s15  }
  0x1a   : > { %p1176_p7 = por %p208_p2, %p57_p10  ;;  %s248_s30 = sand.u32 1, %s1042_s23  }
  0x1b   : > { %s802_s7 = sshll.u32 %s248_s30, 2  ;;  %s803_s9 = sshll.u32 %s1050_s25, 2 }
  0x1c   : > { %s257_s27 = scalar_lea.hbm %s1273_s0, %s803_s9  ;;  %s252_s12 = scalar_lea.vmem [#allocation2], %s802_s7 }
  0x1d   : > { %s261_s13 = sshll.u32 %s252_s12, 4  ;;  %s259_s18 = sshll.u32 %s257_s27, 4  ;;  %s262_s13 = int_to_ptr.vmem [resolvable:$true] %s261_s13  ;;  %s260_s18 = int_to_ptr.hbm [resolvable:$true] %s259_s18 }
  0x1e   : > { %p840_p8 = pnand %p848_p5, %p1156_p11  ;;  %s249_s15 = scalar_lea.sflag [#allocation3], %s248_s30 }
  0x1f   : > { %290 = sbr.rel (%p1137_p3) target bundleno = 437 (0x1b5), region = 44  ;;  %s1190_s5 = sand.u32 (!%p1137_p3), 1, %s1038_s22  }
  0x20   : > { %842 = dma.hbm_to_vmem [thread:$0]  (!%p840_p8), %s260_s18, 64, %s262_s13, %s249_s15  }
  0x21   : > { %s805_s10 = sshll.u32 (!%p1137_p3), %s1190_s5, 2  ;;  %s293_s9 = scalar_lea.sflag (!%p1137_p3), [#allocation3], %s1190_s5 }
  0x22   : > { %s296_s7 = scalar_lea.vmem (!%p1137_p3), [#allocation2], %s805_s10 }
  0x24   : > { %1021 = dma.done.wait (%p1162_p12), %s293_s9, 64  }
  0x25   : > { %1023 = vsyncadd (%p1162_p12), %s293_s9, 4294967232 }
  0x26   : > { %1025 = dma.done.wait (%p1129_p1), [#allocation6], 8192  }
  0x27   : > { %1027 = vsyncadd (%p1129_p1), [#allocation6], 4294959104  ;;  %v1059_v0 = vmov 0   ;;  %p345_p3 = scmp.lt.s32.totalorder %s1046_s24, 1  ;;  %v360_v1 = vld [vmem:[%s296_s7] sm:$0xf]  ;;  %v363_v23 = vlaneseq }
  0x28   : > { %906 = vset.pattern.permute.xlu1 %v1059_v0  ;;  %905 = vset.pattern.permute.xlu0 %v1059_v0  ;;  %s1060_s30 = smov 127   ;;  %s1061_s17 = smov 1   ;;  %vm394_vm0 = vcmask 1043456   ;;  %v810_v4 = vld [vmem:[%s1276_s3 + $0x4] sm:$0xf]  ;;  %vm390_vm1 = vcmask 31744  }
  0x29   : > { %907 = vset.pattern.permute.xlu2 %v1059_v0  ;;  %s346_s8 = scalar_select %p345_p3, %s1046_s24, 1  ;;  %377 = vrot.lane.b32.xlu1 %v360_v1, %s1060_s30  ;;  %v815_v5 = vld [vmem:[%s1276_s3 + $0x8] sm:$0xf]  ;;  %v444_v6 = vld [vmem:[%s1277_s4] sm:$0xf]  ;;  %v534_v8 = vld [vmem:[#allocation5 + $0xe8] sm:$0xff] }
  0x2a   : > { %366 = vrot.lane.b32.xlu0 %v360_v1, %s1061_s17  ;;  %811 = vmatpush.msk.msra.mxu0 %vm394_vm0, %v360_v1  ;;  %v536_v7 = vld [vmem:[#allocation5 + $0xf8] sm:$0xff]  ;;  %v568_v10 = vld [vmem:[#allocation5 + $0x1f0] sm:$0xff]  ;;  %v530_v11 = vld [vmem:[#allocation5 + $0xc8] sm:$0xff]  ;;  %v364_v30 = vand.u32 127, %v363_v23  ;;  %s826_s28 = sshll.u32 %s1046_s24, 3  ;;  %s657_s24 = scalar_lea.sflag [#allocation4], %s1190_s5 }
  0x2b   : > { %s808_s16 = sshll.u32 %s346_s8, 2  ;;  %819 = vmatpush.msk.msra.mxu3 %vm394_vm0, %v360_v1  ;;  %812 = vmatmul.msk.f32.vlgmr.msra.gmra.mxu0 %vm390_vm1, %v810_v4  ;;  %v532_v9 = vld [vmem:[#allocation5 + $0xd8] sm:$0xff]  ;;  %v566_v12 = vld [vmem:[#allocation5 + $0x1e0] sm:$0xff]  ;;  %v564_v14 = vld [vmem:[#allocation5 + $0x1d0] sm:$0xff]  ;;  %s670_s15 = scalar_lea.hbm %s1279_s6, %s826_s28 }
  0x2c   : > { %s358_s12 = scalar_lea.vmem %s1275_s2, %s808_s16  ;;  %s351_s18 = scalar_lea.vmem %s1274_s1, %s808_s16  ;;  %820 = vmatmul.msk.f32.vlgmr.msra.gmra.mxu3 %vm390_vm1, %v815_v5  ;;  %447 = vperm.xlu2 %907, %v444_v6   ;;  %v528_v13 = vld [vmem:[#allocation5 + $0xb8] sm:$0xff]  ;;  %v526_v15 = vld [vmem:[#allocation5 + $0xa8] sm:$0xff]  ;;  %v562_v16 = vld [vmem:[#allocation5 + $0x1c0] sm:$0xff]  ;;  %vm365_vm2 = vcmp.eq.s32.totalorder %v364_v30, 0  ;;  %vm376_vm3 = vcmp.eq.s32.totalorder %v364_v30, 127 }
  0x2d   : > { %v362_v2 = vld [vmem:[%s358_s12] sm:$0xf]  ;;  %630 = vmatpush.msrb.mxu3 %v536_v7  ;;  %570 = vmatpush.msrb.mxu0 %v568_v10  ;;  %v560_v18 = vld [vmem:[#allocation5 + $0x1b0] sm:$0xff]  ;;  %v522_v19 = vld [vmem:[#allocation5 + $0x88] sm:$0xff]  ;;  %s807_s12 = sshll.u32 %s1190_s5, 3  ;;  %s674_s7 = sshll.u32 %s670_s15, 4  ;;  %s675_s7 = int_to_ptr.hbm [resolvable:$true] %s674_s7 }
  0x2e   : > { %v361_v3 = vld [vmem:[%s351_s18] sm:$0xf]  ;;  %v558_v20 = vld [vmem:[#allocation5 + $0x1a0] sm:$0xff]  ;;  %v556_v22 = vld [vmem:[#allocation5 + $0x190] sm:$0xff]  ;;  %s344_s10 = scalar_lea.vmem [#allocation7], %s807_s12  ;;  %s982_s8 = sshra.s32 %s675_s7, 4  ;;  %s983_s8 = int_to_ptr.hbm [resolvable:$true] %s982_s8 }
  0x2f   : > { %631 = vmatpush.msrb.mxu3 %v534_v8  ;;  %571 = vmatpush.msrb.mxu0 %v566_v12  ;;  %v524_v17 = vld [vmem:[#allocation5 + $0x98] sm:$0xff]  ;;  %v518_v24 = vld [vmem:[#allocation5 + $0x68] sm:$0xff]  ;;  %v554_v25 = vld [vmem:[#allocation5 + $0x180] sm:$0xff]  ;;  %s672_s9 = sshll.u32 %s344_s10, 4  ;;  %s984_s16 = scalar_lea.hbm %s983_s8, 8  ;;  %s673_s9 = int_to_ptr.vmem [resolvable:$true] %s672_s9 }
  0x30   : > { %v520_v21 = vld [vmem:[#allocation5 + $0x78] sm:$0xff]  ;;  %v552_v29 = vld [vmem:[#allocation5 + $0x170] sm:$0xff]  ;;  %v514_v31 = vld [vmem:[#allocation5 + $0x48] sm:$0xff]  ;;  %p985_p1 = scmp.ne.s32.totalorder %s983_s8, %s984_s16  ;;  %s988_s11 = scalar_lea.hbm %s1279_s6, 16 }
  0x31   : > { %383 = vperm.xlu1 %906, %v362_v2   ;;  %632 = vmatpush.msrb.mxu3 %v532_v9  ;;  %v516_v28 = vld [vmem:[#allocation5 + $0x58] sm:$0xff]  ;;  %v550_v32 = vld [vmem:[#allocation5 + $0x160] sm:$0xff]  ;;  %v535_v40 = vld [vmem:[#allocation5 + $0xf0] sm:$0xff]  ;;  %p989_p11 = scmp.lt.s32.totalorder %s983_s8, %s1279_s6  ;;  %p990_p12 = scmp.lt.s32.totalorder %s988_s11, %s984_s16 }
  0x32   : > { %372 = vperm.xlu0 %905, %v361_v3   ;;  %572 = vmatpush.msrb.mxu0 %v564_v14  ;;  %v512_v33 = vld [vmem:[#allocation5 + $0x38] sm:$0xff]  ;;  %v816_v37 = vld [vmem:[%s1276_s3 + $0xc] sm:$0xf]  ;;  %v567_v43 = vld [vmem:[#allocation5 + $0x1e8] sm:$0xff]  ;;  %p986_p9 = pnand %p985_p1, %p1168_p4 }
  0x33   : > { %633 = vmatpush.msrb.mxu3 %v530_v11  ;;  %v387_v36 = vld [vmem:[%s1276_s3] sm:$0xf]  ;;  %v533_v42 = vld [vmem:[#allocation5 + $0xe0] sm:$0xff]  ;;  %v531_v44 = vld [vmem:[#allocation5 + $0xd0] sm:$0xff]  ;;  %p991_p13 = por %p990_p12, %p989_p11 }
  0x34   : > { %573 = vmatpush.msrb.mxu0 %v562_v16  ;;  %v569_v41 = vld [vmem:[#allocation5 + $0x1f8] sm:$0xff]  ;;  %v529_v46 = vld [vmem:[#allocation5 + $0xc0] sm:$0xff]  ;;  %v563_v47 = vld [vmem:[#allocation5 + $0x1c8] sm:$0xff]  ;;  %p987_p10 = pneg %p986_p9 }
  0x35   : > { %634 = vmatpush.msrb.mxu3 %v528_v13  ;;  %v565_v45 = vld [vmem:[#allocation5 + $0x1d8] sm:$0xff]  ;;  %v527_v48 = vld [vmem:[#allocation5 + $0xb0] sm:$0xff]  ;;  %v525_v50 = vld [vmem:[#allocation5 + $0xa0] sm:$0xff] }
  0x36   : > { %574 = vmatpush.msrb.mxu0 %v560_v18  ;;  %v561_v49 = vld [vmem:[#allocation5 + $0x1b8] sm:$0xff]  ;;  %v559_v51 = vld [vmem:[#allocation5 + $0x1a8] sm:$0xff]  ;;  %v523_v52 = vld [vmem:[#allocation5 + $0x90] sm:$0xff]  ;;  %p992_p0 = pnand %p991_p13, %p987_p10 }
  0x37   : > { %635 = vmatpush.msrb.mxu3 %v526_v15  ;;  %v557_v53 = vld [vmem:[#allocation5 + $0x198] sm:$0xff]  ;;  %v521_v54 = vld [vmem:[#allocation5 + $0x80] sm:$0xff]  ;;  %v555_v55 = vld [vmem:[#allocation5 + $0x188] sm:$0xff] }
  0x38   : > { %575 = vmatpush.msrb.mxu0 %v558_v20  ;;  %v519_v56 = vld [vmem:[#allocation5 + $0x70] sm:$0xff]  ;;  %v553_v57 = vld [vmem:[#allocation5 + $0x178] sm:$0xff]  ;;  %v517_v58 = vld [vmem:[#allocation5 + $0x60] sm:$0xff] }
  0x39   : > { %636 = vmatpush.msrb.mxu3 %v524_v17  ;;  %v551_v59 = vld [vmem:[#allocation5 + $0x168] sm:$0xff]  ;;  %v515_v60 = vld [vmem:[#allocation5 + $0x50] sm:$0xff]  ;;  %v513_v61 = vld [vmem:[#allocation5 + $0x40] sm:$0xff] }
  0x3a   : > { %576 = vmatpush.msrb.mxu0 %v556_v22  ;;  %v511_v62 = vld [vmem:[#allocation5 + $0x30] sm:$0xff]  ;;  %v549_v0 = vld [vmem:[#allocation5 + $0x158] sm:$0xff]  ;;  %v509_v1 = vld [vmem:[#allocation5 + $0x20] sm:$0xff] }
  0x3b   : > { %637 = vmatpush.msrb.mxu3 %v522_v19  ;;  %v548_v63 = vld [vmem:[#allocation5 + $0x150] sm:$0xff]  ;;  %v510_v2 = vld [vmem:[#allocation5 + $0x28] sm:$0xff]  ;;  %v546_v3 = vld [vmem:[#allocation5 + $0x140] sm:$0xff] }
  0x3c   : > { %577 = vmatpush.msrb.mxu0 %v554_v25  ;;  %v547_v4 = vld [vmem:[#allocation5 + $0x148] sm:$0xff]  ;;  %v507_v5 = vld [vmem:[#allocation5 + $0x10] sm:$0xff]  ;;  %v508_v6 = vld [vmem:[#allocation5 + $0x18] sm:$0xff] }
  0x3d   : > { %638 = vmatpush.msrb.mxu3 %v520_v21  ;;  %v544_v7 = vld [vmem:[#allocation5 + $0x130] sm:$0xff]  ;;  %v545_v8 = vld [vmem:[#allocation5 + $0x138] sm:$0xff]  ;;  %v505_v9 = vld [vmem:[#allocation5] sm:$0xff] }
  0x3e   : > { %578 = vmatpush.msrb.mxu0 %v552_v29  ;;  %v506_v10 = vld [vmem:[#allocation5 + $0x8] sm:$0xff]  ;;  %v542_v11 = vld [vmem:[#allocation5 + $0x120] sm:$0xff]  ;;  %v540_v13 = vld [vmem:[#allocation5 + $0x110] sm:$0xff] }
  0x3f   : > { %639 = vmatpush.msrb.mxu3 %v518_v24  ;;  %v543_v12 = vld [vmem:[#allocation5 + $0x128] sm:$0xff]  ;;  %v541_v14 = vld [vmem:[#allocation5 + $0x118] sm:$0xff]  ;;  %v538_v15 = vld [vmem:[#allocation5 + $0x100] sm:$0xff] }
  0x40   : > { %579 = vmatpush.msrb.mxu0 %v550_v32  ;;  %v539_v16 = vld [vmem:[#allocation5 + $0x108] sm:$0xff] }
  0x41   : > { %640 = vmatpush.msrb.mxu3 %v516_v28 }
  0x42   : > { %580 = vmatpush.msrb.mxu0 %v548_v63 }
  0x43   : > { %641 = vmatpush.msrb.mxu3 %v514_v31 }
  0x44   : > { %581 = vmatpush.msrb.mxu0 %v546_v3 }
  0x45   : > { %642 = vmatpush.msrb.mxu3 %v512_v33 }
  0x46   : > { %582 = vmatpush.msrb.mxu0 %v544_v7 }
  0x47   : > { %643 = vmatpush.msrb.mxu3 %v510_v2 }
  0x48   : > { %583 = vmatpush.msrb.mxu0 %v542_v11 }
  0x49   : > { %644 = vmatpush.msrb.mxu3 %v508_v6 }
  0x4a   : > { %584 = vmatpush.msrb.mxu0 %v540_v13 }
  0x4b   : > { %645 = vmatpush.msrb.mxu3 %v506_v10 }
  0x4c   : > { %585 = vmatpush.msrb.mxu0 %v538_v15 }
  0x86   : > { %v448_v19 = vpop.permute.xlu2 %447 }
  0x9b   : > { %v378_v26 = vpop.permute.xlu1 %377 }
  0x9c   : > { %v367_v27 = vpop.permute.xlu0 %366 }
  0xa3   : > { %v384_v34 = vpop.permute.xlu1 %383 }
  0xa4   : > { %v373_v35 = vpop.permute.xlu0 %372  ;;  %v386_v39 = vsel %vm376_vm3, %v384_v34, %v378_v26 }
  0xa5   : > { %v375_v38 = vsel %vm365_vm2, %v373_v35, %v367_v27  ;;  %817 = vmatpush.msk.msra.mxu2 %vm394_vm0, %v386_v39 }
  0xa6   : > { %813 = vmatpush.msk.msra.mxu1 %vm394_vm0, %v375_v38  ;;  %818 = vmatmul.msk.f32.vlgmr.msra.gmra.mxu2 %vm390_vm1, %v816_v37 }
  0xa7   : > { %814 = vmatmul.msk.f32.vlgmr.msra.gmra.mxu1 %vm390_vm1, %v387_v36  ;;  %610 = vmatpush.msrb.mxu2 %v535_v40 }
  0xa8   : > { %590 = vmatpush.msrb.mxu1 %v569_v41  ;;  %v415_v17 = vpop.f32.mrf.mxu0 }
  0xa9   : > { %611 = vmatpush.msrb.mxu2 %v533_v42 }
  0xaa   : > { %591 = vmatpush.msrb.mxu1 %v567_v43 }
  0xab   : > { %612 = vmatpush.msrb.mxu2 %v531_v44 }
  0xac   : > { %592 = vmatpush.msrb.mxu1 %v565_v45 }
  0xad   : > { %613 = vmatpush.msrb.mxu2 %v529_v46 }
  0xae   : > { %593 = vmatpush.msrb.mxu1 %v563_v47 }
  0xaf   : > { %614 = vmatpush.msrb.mxu2 %v527_v48  ;;  %v501_v22 = vpop.f32.mrf.mxu3 }
  0xb0   : > { %594 = vmatpush.msrb.mxu1 %v561_v49 }
  0xb1   : > { %615 = vmatpush.msrb.mxu2 %v525_v50 }
  0xb2   : > { %595 = vmatpush.msrb.mxu1 %v559_v51 }
  0xb3   : > { %616 = vmatpush.msrb.mxu2 %v523_v52 }
  0xb4   : > { %596 = vmatpush.msrb.mxu1 %v557_v53 }
  0xb5   : > { %617 = vmatpush.msrb.mxu2 %v521_v54 }
  0xb6   : > { %597 = vmatpush.msrb.mxu1 %v555_v55 }
  0xb7   : > { %618 = vmatpush.msrb.mxu2 %v519_v56 }
  0xb8   : > { %598 = vmatpush.msrb.mxu1 %v553_v57 }
  0xb9   : > { %619 = vmatpush.msrb.mxu2 %v517_v58 }
  0xba   : > { %599 = vmatpush.msrb.mxu1 %v551_v59 }
  0xbb   : > { %620 = vmatpush.msrb.mxu2 %v515_v60 }
  0xbc   : > { %600 = vmatpush.msrb.mxu1 %v549_v0 }
  0xbd   : > { %621 = vmatpush.msrb.mxu2 %v513_v61 }
  0xbe   : > { %601 = vmatpush.msrb.mxu1 %v547_v4 }
  0xbf   : > { %622 = vmatpush.msrb.mxu2 %v511_v62 }
  0xc0   : > { %602 = vmatpush.msrb.mxu1 %v545_v8 }
  0xc1   : > { %623 = vmatpush.msrb.mxu2 %v509_v1 }
  0xc2   : > { %603 = vmatpush.msrb.mxu1 %v543_v12 }
  0xc3   : > { %624 = vmatpush.msrb.mxu2 %v507_v5 }
  0xc4   : > { %604 = vmatpush.msrb.mxu1 %v541_v14 }
  0xc5   : > { %625 = vmatpush.msrb.mxu2 %v505_v9 }
  0xc6   : > { %605 = vmatpush.msrb.mxu1 %v539_v16 }
 0x124   : > { %v441_v18 = vpop.f32.mrf.mxu1 }
 0x125   : > { %v442_v20 = vadd.f32 %v441_v18, %v415_v17 }
 0x127   : > { %v450_v21 = vadd.f32 %v448_v19, %v442_v20 }
 0x129   : > { %626 = vmatmul.f32.vlgmr.msrb.gmra.mxu2 %v450_v21  ;;  %646 = vmatmul.f32.vlgmr.msrb.gmra.mxu3 %v450_v21  ;;  %v478_v23 = vpop.f32.mrf.mxu2 }
 0x12a   : > { %v502_v24 = vadd.f32 %v501_v22, %v478_v23 }
 0x12c   : > { %v504_v25 = vadd.f32 %v502_v24, %v448_v19 }
 0x12e   : > { %586 = vmatmul.f32.vlgmr.msrb.gmra.mxu0 %v504_v25  ;;  %606 = vmatmul.f32.vlgmr.msrb.gmra.mxu1 %v504_v25 }
 0x1ab   : > { %v587_v26 = vpop.f32.mrf.mxu0  ;;  %v607_v27 = vpop.f32.mrf.mxu1 }
 0x1ac   : > { %v627_v28 = vpop.f32.mrf.mxu2  ;;  %v647_v29 = vpop.f32.mrf.mxu3 }
 0x1ad   : > { %v648_v30 = vadd.f32 %v647_v29, %v607_v27  ;;  %v628_v31 = vadd.f32 %v627_v28, %v587_v26 }
 0x1af   : > { %v652_v32 = vrot.slane %v648_v30, 4 }
 0x1b1   : > { %v653_v33 = vsel %vm394_vm0, %v628_v31, %v652_v32 }
 0x1b2   : > { %655 = vst [vmem:[%s344_s10] sm:$0xff] %v653_v33 }
 0x1b3   : > { %995 = shalt.err (!%p992_p0)
}
 0x1b4   : > { %833 = dma.vmem_to_hbm [thread:$0]  (%p1168_p4), %s673_s9, 128, %s675_s7, %s657_s24  }
 0x1b5 PF: > { %s686_s5 = sand.u32 1, %s1034_s21   ;;  %p844_p2 = pnand %p801_p6, %p1176_p7 }
 0x1b6   : > { %s687_s28 = scalar_lea.sflag [#allocation4], %s686_s5 }
 0x1b7   : > { %p845_p5 = pneg %p844_p2 }
 0x1b9   : > { %1029 = dma.done.wait (%p845_p5), %s687_s28, 128  }
 0x1ba   : > { %1031 = vsyncadd (%p845_p5), %s687_s28, 4294967168  ;;  %s23_s26 = sadd.s32 1, %s1054_s26   ;;  %s1288_s21 = smov %s1038_s22 }
 0x1bb   : > { %p20_p8 = scmp.ge.s32.totalorder %s23_s26, 4   ;;  %s1289_s22 = smov %s1042_s23 }
 0x1bc   : > { %s1290_s23 = smov %s1174_s20  ;;  %s1291_s24 = smov %s1050_s25 }
 0x1bd   : > { %s1292_s25 = smov %s1294_s14  ;;  %22 = sbr.rel (!%p20_p8) target bundleno = 9 (0x9), region = 103 }
 0x1c2   :  { %693 = vsyncpa [#allocation3], 1 }
 0x1c3   :  { %695 = vsyncpa [#allocation3 + $0x1], 1 }
 0x1c4   :  { %696 = vsyncpa [#allocation6], 1 }
 0x1c5   :  { %697 = vsyncpa [#allocation4], 1 }
 0x1c6   :  { %699 = vsyncpa [#allocation4 + $0x1], 1 }

</bundles_post_ra>
